<compile_context>
chip_gen: v7x
topology: tpu7x:2x2x1
jax: 0.10.0
libtpu: 0.0.40
codegen_flags: <defaults>
</compile_context>

<pallas_src>
import functools

import numpy as np
import jax
import jax.numpy as jnp
from jax.experimental import pallas as pl
from jax.experimental.pallas import tpu as pltpu


# ----------------------------------------------------------------------------
# Fused kernel: Linear (no bias) -> BatchNorm1d (batch stats) -> ReLU
# ----------------------------------------------------------------------------
def _fc_bn_relu_kernel(x_ref, w_ref, gb_ref, o_ref, *, eps, matmul_dtype):
    x = x_ref[...]                                            # (B, D_in)
    w = w_ref[...]                                            # (D_in, tile_n)
    if matmul_dtype is not None:
        x = x.astype(matmul_dtype)
        w = w.astype(matmul_dtype)

    # Linear (bias=False), f32 accumulation on the MXU.
    h = jnp.dot(x, w, preferred_element_type=jnp.float32)     # (B, tile_n) f32

    # BatchNorm1d training-mode forward (biased batch statistics), fused into a
    # single scale/shift epilogue.  Stats are per-feature so D_out tiling is exact.
    inv_b = 1.0 / h.shape[0]
    s1 = jnp.sum(h, axis=0, keepdims=True)                    # (1, tile_n)
    s2 = jnp.sum(h * h, axis=0, keepdims=True)                # (1, tile_n)
    mean = s1 * inv_b
    var = jnp.maximum(s2 * inv_b - mean * mean, 0.0)          # clamp fp rounding

    gb = gb_ref[...]                                          # (2, tile_n)
    gamma = gb[0:1, :]
    beta = gb[1:2, :]
    scale = gamma * jax.lax.rsqrt(var + eps)                  # EUP rsqrt (free slot)
    shift = beta - mean * scale

    # Normalize + affine + ReLU in one pass over the tile.
    y = jnp.maximum(h * scale + shift, 0.0)

    # TODO(synk): dropout with p_dropout > 0 would need pltpu.prng_seed /
    # prng_random_bits; module default p_dropout=0.0 makes it the identity.
    # TODO(synk): PyTorch train-mode BN also updates running_mean/running_var
    # (unbiased); this kernel returns only the normalized activations.
    o_ref[...] = y.astype(o_ref.dtype)


# ----------------------------------------------------------------------------
# Tile-size heuristic for the D_out-tiled path.
# ----------------------------------------------------------------------------
def _pick_tile_n(d_in, d_out, itemsize,
                 single_block_weight_budget=6 << 20,   # skip the grid below this
                 tile_weight_budget=4 << 20):          # per-buffer weight tile bytes
    if d_out % 128 != 0:
        return None                                    # fall back to single block
    if d_in * d_out * itemsize <= single_block_weight_budget:
        return None                                    # tiny: gridless path wins
    best = None
    for t in range(128, d_out + 1, 128):
        if d_out % t == 0 and d_in * t * itemsize <= tile_weight_budget:
            best = t
    return best if best is not None else 128


# ----------------------------------------------------------------------------
# Wrapper
# ----------------------------------------------------------------------------
def fully_connected_layer(x, w, gamma, beta, *, eps=1e-5,
                          matmul_dtype=None, out_dtype=None, tile_n=None):
    """Fused Linear(no bias) -> BatchNorm1d(train) -> ReLU -> Dropout(p=0).

    x:     (B, D_in)
    w:     (D_in, D_out)   -- PyTorch nn.Linear weight (out,in) passed transposed
    gamma: (D_out,)        -- BatchNorm1d weight
    beta:  (D_out,)        -- BatchNorm1d bias
    """
    B, D_in = x.shape
    D_in_w, D_out = w.shape
    assert D_in_w == D_in
    out_dtype = out_dtype or x.dtype

    # Merge gamma/beta into one (2, D_out) operand: one BlockSpec, one DMA.
    gb = jnp.stack([gamma.reshape(-1), beta.reshape(-1)], axis=0)

    kernel = functools.partial(_fc_bn_relu_kernel, eps=eps,
                               matmul_dtype=matmul_dtype)
    out_shape = jax.ShapeDtypeStruct((B, D_out), out_dtype)

    if tile_n is None:
        tile_n = _pick_tile_n(D_in, D_out, jnp.dtype(w.dtype).itemsize)

    # --- Small-shape path: gridless, whole arrays resident in VMEM. ---------
    if tile_n is None or tile_n >= D_out:
        return pl.pallas_call(
            kernel,
            out_shape=out_shape,
            in_specs=[
                pl.BlockSpec(memory_space=pltpu.MemorySpace.VMEM),
                pl.BlockSpec(memory_space=pltpu.MemorySpace.VMEM),
                pl.BlockSpec(memory_space=pltpu.MemorySpace.VMEM),
            ],
            out_specs=pl.BlockSpec(memory_space=pltpu.MemorySpace.VMEM),
        )(x, w, gb)

    # --- Scaling path: tile the feature dim, pipeline the weight stream. ----
    grid = (D_out // tile_n,)
    return pl.pallas_call(
        kernel,
        out_shape=out_shape,
        grid_spec=pltpu.PrefetchScalarGridSpec(
            num_scalar_prefetch=0,
            grid=grid,
            in_specs=[
                pl.BlockSpec((B, D_in), lambda j: (0, 0)),       # x: resident
                pl.BlockSpec((D_in, tile_n), lambda j: (0, j)),  # w: streamed
                pl.BlockSpec((2, tile_n), lambda j: (0, j)),     # gamma/beta
            ],
            out_specs=pl.BlockSpec((B, tile_n), lambda j: (0, j)),
        ),
        compiler_params=pltpu.CompilerParams(
            dimension_semantics=("parallel",),       # 2 TCs on v7x; no-op on v5e/v6e
            vmem_limit_bytes=32 << 20,               # safe on v5e/v6e/v7x
        ),
    )(x, w, gb)


# ----------------------------------------------------------------------------
# Pure-JAX reference (mirrors the PyTorch forward in train mode, p_dropout=0)
# ----------------------------------------------------------------------------
def reference(x, w, gamma, beta, eps=1e-5):
    h = x @ w
    mean = h.mean(axis=0, keepdims=True)
    var = ((h - mean) ** 2).mean(axis=0, keepdims=True)
    y = (h - mean) / jnp.sqrt(var + eps)
    y = y * gamma.reshape(1, -1) + beta.reshape(1, -1)
    return jnp.maximum(y, 0.0)


# ----------------------------------------------------------------------------
if __name__ == "__main__":
    key = jax.random.PRNGKey(0)

    def make_inputs(k, B, D_in, D_out):
        kx, kw, kg, kb = jax.random.split(k, 4)
        x = jax.random.normal(kx, (B, D_in), jnp.float32)
        w = 0.1 * jax.random.normal(kw, (D_in, D_out), jnp.float32)
        gamma = 1.0 + 0.1 * jax.random.normal(kg, (D_out,), jnp.float32)
        beta = 0.1 * jax.random.normal(kb, (D_out,), jnp.float32)
        return x, w, gamma, beta

    # 1) Toy shape -> gridless single-block path (B=8 fills one f32 sublane
    #    tile; D_out=128 gives a lane-dense, unmasked output store).
    k1, k2 = jax.random.split(key)
    x, w, gamma, beta = make_inputs(k1, B=8, D_in=64, D_out=128)
    out = jax.block_until_ready(
        jax.jit(functools.partial(fully_connected_layer, eps=1e-5))(x, w, gamma, beta))
    ref = jax.block_until_ready(reference(x, w, gamma, beta))
    assert out.shape == (8, 128), out.shape
    np.testing.assert_allclose(np.asarray(out), np.asarray(ref), rtol=1e-3, atol=1e-4)

    # 2) Slightly larger shape, forced tile_n=128 -> exercises the D_out-tiled
    #    ("parallel") grid path with a 4-step weight-streaming pipeline.
    x2, w2, g2, b2 = make_inputs(k2, B=8, D_in=128, D_out=512)
    out2 = jax.block_until_ready(
        jax.jit(functools.partial(fully_connected_layer, eps=1e-5, tile_n=128))(
            x2, w2, g2, b2))
    ref2 = jax.block_until_ready(reference(x2, w2, g2, b2))
    assert out2.shape == (8, 512), out2.shape
    np.testing.assert_allclose(np.asarray(out2), np.asarray(ref2), rtol=1e-3, atol=1e-4)

    print("KERNEL_OK")
</pallas_src>

<mosaic_0001>
module attributes {stable_mosaic.version = 11 : i64} {
  func.func @_fc_bn_relu_kernel(%arg0: memref<8x64xf32, #tpu.memory_space<vmem>>, %arg1: memref<64x128xf32, #tpu.memory_space<vmem>>, %arg2: memref<2x128xf32, #tpu.memory_space<vmem>>, %arg3: memref<8x128xf32, #tpu.memory_space<vmem>>) attributes {dimension_semantics = [], scalar_prefetch = 0 : i64, scratch_operands = 0 : i64, tpu.core_type = #tpu.core_type<tc>} {
    %c0 = arith.constant 0 : index
    %c0_0 = arith.constant 0 : index
    %0 = vector.load %arg0[%c0, %c0_0] : memref<8x64xf32, #tpu.memory_space<vmem>>, vector<8x64xf32>
    %c0_1 = arith.constant 0 : index
    %c0_2 = arith.constant 0 : index
    %1 = vector.load %arg1[%c0_1, %c0_2] : memref<64x128xf32, #tpu.memory_space<vmem>>, vector<64x128xf32>
    %cst = arith.constant dense<0.000000e+00> : vector<8x128xf32>
    %2 = tpu.matmul %0, %1, %cst {dimension_numbers = #tpu.dot_dimension_numbers<[1], [0], [0], [1], [0, 0, 1, 1], [], []>} : vector<8x64xf32>, vector<64x128xf32>, vector<8x128xf32> -> vector<8x128xf32>
    %cst_3 = arith.constant dense<0.000000e+00> : vector<128xf32>
    %3 = vector.multi_reduction <add>, %2, %cst_3 [0] : vector<8x128xf32> to vector<128xf32>
    %4 = vector.shape_cast %3 : vector<128xf32> to vector<1x128xf32>
    %5 = arith.mulf %2, %2 : vector<8x128xf32>
    %cst_4 = arith.constant dense<0.000000e+00> : vector<128xf32>
    %6 = vector.multi_reduction <add>, %5, %cst_4 [0] : vector<8x128xf32> to vector<128xf32>
    %7 = vector.shape_cast %6 : vector<128xf32> to vector<1x128xf32>
    %cst_5 = arith.constant 1.250000e-01 : f32
    %8 = vector.broadcast %cst_5 : f32 to vector<1x128xf32>
    %9 = arith.mulf %4, %8 : vector<1x128xf32>
    %cst_6 = arith.constant 1.250000e-01 : f32
    %10 = vector.broadcast %cst_6 : f32 to vector<1x128xf32>
    %11 = arith.mulf %7, %10 : vector<1x128xf32>
    %12 = arith.mulf %9, %9 : vector<1x128xf32>
    %13 = arith.subf %11, %12 : vector<1x128xf32>
    %cst_7 = arith.constant 0.000000e+00 : f32
    %14 = vector.broadcast %cst_7 : f32 to vector<1x128xf32>
    %15 = arith.maximumf %13, %14 : vector<1x128xf32>
    %c0_8 = arith.constant 0 : index
    %c0_9 = arith.constant 0 : index
    %16 = vector.load %arg2[%c0_8, %c0_9] : memref<2x128xf32, #tpu.memory_space<vmem>>, vector<2x128xf32>
    %17 = vector.extract_strided_slice %16 {offsets = [0, 0], sizes = [1, 128], strides = [1, 1]} : vector<2x128xf32> to vector<1x128xf32>
    %18 = vector.extract_strided_slice %16 {offsets = [1, 0], sizes = [1, 128], strides = [1, 1]} : vector<2x128xf32> to vector<1x128xf32>
    %cst_10 = arith.constant 9.99999974E-6 : f32
    %19 = vector.broadcast %cst_10 : f32 to vector<1x128xf32>
    %20 = arith.addf %15, %19 : vector<1x128xf32>
    %21 = math.rsqrt %20 : vector<1x128xf32>
    %22 = arith.mulf %17, %21 : vector<1x128xf32>
    %23 = arith.mulf %9, %22 : vector<1x128xf32>
    %24 = arith.subf %18, %23 : vector<1x128xf32>
    %25 = vector.broadcast %22 : vector<1x128xf32> to vector<8x128xf32>
    %26 = arith.mulf %2, %25 : vector<8x128xf32>
    %27 = vector.broadcast %24 : vector<1x128xf32> to vector<8x128xf32>
    %28 = arith.addf %26, %27 : vector<8x128xf32>
    %cst_11 = arith.constant 0.000000e+00 : f32
    %29 = vector.broadcast %cst_11 : f32 to vector<8x128xf32>
    %30 = arith.maximumf %28, %29 : vector<8x128xf32>
    %c0_12 = arith.constant 0 : index
    %c0_13 = arith.constant 0 : index
    %31 = vector.load %arg3[%c0_12, %c0_13] : memref<8x128xf32, #tpu.memory_space<vmem>>, vector<8x128xf32>
    tpu.vector_store %arg3[%c0_12, %c0_13], %30 {strides = array<i32>} : memref<8x128xf32, #tpu.memory_space<vmem>>, vector<8x128xf32>,
    return
  }
}

</mosaic_0001>

<bundles_post_ra>
// kernel: fully_connected_layer.1
= control target key start
LH: loop header
LB: loop body
LE: loop exit
PB: predicated region body
PF: predicated region fallthrough
CT: control target
= control target key end

     0   :  { %8 = vsyncpa [#allocation3], 0  ;;  %s321_s0 = inlined_call_operand.vmem [shape: f32[8,64], index: 0, kind: input, shape index: {}]   ;;  %s322_s1 = inlined_call_operand.hbm [shape: f32[64,128], index: 1, kind: input, shape index: {}]   ;;  %s323_s2 = inlined_call_operand.vmem [shape: f32[2,128], index: 2, kind: input, shape index: {}]   ;;  %s324_s3 = inlined_call_operand.hbm [shape: f32[8,128], index: 3, kind: output, shape index: {}]  }
   0x1   :  { %9 = vsyncpa [#allocation4], 0  ;;  %s264_s12 = smov [#allocation2]   ;;  %s216_s16 = scalar_lea.hbm %s322_s1, 1024 }
   0x2   :  { %s17_s13 = sshll.u32 %s264_s12, 4  ;;  %p217_p0 = scmp.ne.s32.totalorder %s322_s1, %s216_s16  ;;  %s18_s13 = int_to_ptr.vmem [resolvable:$true] %s17_s13 }
   0x3   :  { %p220_p1 = scmp.lt.u32.totalorder %s216_s16, %s322_s1 }
   0x5   :  { %p222_p2 = pnand %p220_p1, %p217_p0 }
   0x7   :  { %225 = shalt.err (!%p222_p2)
}
   0x8   :  { %s226_s21 = scalar_lea.vmem %s18_s13, 1024  ;;  %p231_p4 = scmp.lt.s32.totalorder %s18_s13, %s18_s13 }
   0x9   :  { %p227_p3 = scmp.ne.s32.totalorder %s18_s13, %s226_s21  ;;  %p232_p5 = scmp.lt.s32.totalorder %s226_s21, %s226_s21 }
   0xb   :  { %p233_p6 = por %p232_p5, %p231_p4 }
   0xd   :  { %p234_p7 = pnand %p233_p6, %p227_p3 }
   0xf   :  { %237 = shalt.err (!%p234_p7)
}
  0x10   :  { %s265_s22 = smov 128   ;;  %s266_s23 = smov 8  }
  0x11   :  { %23 = dma.hbm_to_vmem [thread:$0]  %s322_s1, 1024, %s18_s13, [#allocation3], %s265_s22, %s265_s22, %s266_s23  }
  0x12   :  { %260 = dma.done.wait [#allocation3], 1024  }
  0x13   :  { %261 = vsyncadd [#allocation3], 4294966272  ;;  %v267_v0 = vmov 0.0|0.0   ;;  %vm268_vm0 = vmmov 0   ;;  %v269_v1 = vmov 0.0   ;;  %v30_v2 = vld [vmem:[#allocation2] sm:$0xff]  ;;  %v139_v36 = vlaneseq }
  0x14   :  { %195 = vmatprep.subr.bf16.mxu0 %v267_v0  ;;  %192 = vmatprep.mubr.msk.f32.mxu0 %vm268_vm0, %v269_v1  ;;  %v31_v3 = vld [vmem:[#allocation2 + $0x8] sm:$0xff]  ;;  %v32_v4 = vld [vmem:[#allocation2 + $0x10] sm:$0xff]  ;;  %v33_v6 = vld [vmem:[#allocation2 + $0x18] sm:$0xff]  ;;  %vm38_vm1 = vcmask 523264   ;;  %s270_s28 = smov [#allocation5]  }
  0x15   :  { %v196_v5 = vpack.c.bf16 %v31_v3, %v30_v2  ;;  %v199_v7 = vpack.c.bf16 %v33_v6, %v32_v4  ;;  %v34_v8 = vld [vmem:[#allocation2 + $0x20] sm:$0xff]  ;;  %v35_v9 = vld [vmem:[#allocation2 + $0x28] sm:$0xff]  ;;  %v36_v11 = vld [vmem:[#allocation2 + $0x30] sm:$0xff]  ;;  %v140_v37 = vshrl.u32 %v139_v36, 7  ;;  %s157_s29 = sshll.u32 %s270_s28, 4  ;;  %s158_s29 = int_to_ptr.vmem [resolvable:$true] %s157_s29 }
  0x16   :  { %v202_v10 = vpack.c.bf16 %v35_v9, %v34_v8  ;;  %v37_v12 = vld [vmem:[#allocation2 + $0x38] sm:$0xff]  ;;  %v29_v14 = vld [vmem:[%s321_s0] sm:$0xff]  ;;  %s238_s30 = scalar_lea.vmem %s158_s29, 128  ;;  %p243_p9 = scmp.lt.s32.totalorder %s158_s29, %s158_s29 }
  0x17   :  { %197 = vmatpush3.bf16.msra.mxu0 %v196_v5  ;;  %v205_v13 = vpack.c.bf16 %v37_v12, %v36_v11  ;;  %v130_v38 = vld [vmem:[%s323_s2] sm:$0x3]  ;;  %v141_v41 = vsub.s32 0, %v140_v37  ;;  %v146_v45 = vsub.s32 1, %v140_v37  ;;  %p239_p8 = scmp.ne.s32.totalorder %s158_s29, %s238_s30  ;;  %p244_p10 = scmp.lt.s32.totalorder %s238_s30, %s238_s30 }
  0x18   :  { %198 = vmatprep.subr.bf16.mxu0 %v267_v0 }
  0x19   :  { %p245_p11 = por %p244_p10, %p243_p9 }
  0x1b   :  { %200 = vmatpush3.bf16.msra.mxu0 %v199_v7  ;;  %p246_p12 = pnand %p245_p11, %p239_p8 }
  0x1c   :  { %201 = vmatprep.subr.bf16.mxu0 %v267_v0 }
  0x1f   :  { %203 = vmatpush3.bf16.msra.mxu0 %v202_v10 }
  0x20   :  { %204 = vmatprep.subr.bf16.mxu0 %v267_v0 }
  0x23   :  { %206 = vmatpush3.bf16.msra.mxu0 %v205_v13 }
  0x26   :  { %193 = vmatmul.mubr.msk.f32.vlgmr.msra.gmra.mrb[0].mxu0 %vm38_vm1, %v29_v14 }
  0xf9   :  { %v108_v15 = vpop.f32.mrb[0].mxu0 }
  0xfa   :  { %v112_v16 = vrot.slane %v108_v15, 4  ;;  %v118_v17 = vmul.f32 %v108_v15, %v108_v15  ;;  %v194_v18 = vpop.f32.mrb[1].mxu0 }
  0xfc   :  { %v113_v19 = vadd.f32 %v112_v16, %v108_v15  ;;  %v119_v20 = vrot.slane %v118_v17, 4 }
  0xfe   :  { %v114_v21 = vrot.slane %v113_v19, 2  ;;  %v120_v22 = vadd.f32 %v119_v20, %v118_v17 }
 0x100   :  { %v115_v23 = vadd.f32 %v114_v21, %v113_v19  ;;  %v121_v24 = vrot.slane %v120_v22, 2 }
 0x102   :  { %v116_v25 = vrot.slane %v115_v23, 1  ;;  %v122_v26 = vadd.f32 %v121_v24, %v120_v22 }
 0x104   :  { %v117_v27 = vadd.f32 %v116_v25, %v115_v23  ;;  %v123_v28 = vrot.slane %v122_v26, 1 }
 0x106   :  { %v124_v29 = vadd.f32 %v123_v28, %v122_v26  ;;  %v125_v30 = vmul.f32 0.125, %v117_v27 }
 0x108   :  { %v126_v31 = vmul.f32 0.125, %v124_v29  ;;  %v127_v32 = vmul.f32 %v125_v30, %v125_v30 }
 0x10a   :  { %v128_v33 = vsub.f32 %v126_v31, %v127_v32 }
 0x10c   :  { %v129_v34 = vmax.f32 %v128_v33, 0.0 }
 0x10e   :  { %v131_v35 = vadd.f32 1e-05, %v129_v34 }
 0x110   :  { %214 = vrsqrt.f32 %v131_v35 }
 0x11a   :  { %v215_v39 = vpop.eup %214 }
 0x11b   :  { %v133_v40 = vmul.f32 %v215_v39, %v130_v38 }
 0x11d   :  { %v134_v42 = vmul.f32 %v133_v40, %v125_v30  ;;  %v142_v43 = vrot.slane %v133_v40, %v141_v41 }
 0x11f   :  { %v136_v44 = vrot.slane %v134_v42, 7  ;;  %v143_v47 = vmul.f32 %v142_v43, %v108_v15 }
 0x121   :  { %v138_v46 = vsub.f32 %v130_v38, %v136_v44 }
 0x123   :  { %v147_v48 = vrot.slane %v138_v46, %v146_v45 }
 0x125   :  { %v148_v49 = vadd.f32 %v147_v48, %v143_v47 }
 0x127   :  { %v149_v50 = vmax.f32 %v148_v49, 0.0 }
 0x129   :  { %150 = vst [vmem:[#allocation5] sm:$0xff] %v149_v50 }
 0x12a   :  { %249 = shalt.err (!%p246_p12)
}
 0x12b   :  { %s250_s5 = scalar_lea.hbm %s324_s3, 128 }
 0x12c   :  { %p251_p13 = scmp.ne.s32.totalorder %s324_s3, %s250_s5  ;;  %p254_p0 = scmp.lt.u32.totalorder %s250_s5, %s324_s3 }
 0x12e   :  { %p256_p1 = pnand %p254_p0, %p251_p13 }
 0x130   :  { %259 = shalt.err (!%p256_p1)
}
 0x131   :  { %160 = dma.vmem_to_hbm [thread:$0]  %s158_s29, 128, %s324_s3, [#allocation4]  }
 0x132   :  { %262 = dma.done.wait [#allocation4], 128  }
 0x133   :  { %263 = vsyncadd [#allocation4], 4294967168 }
 0x134   :  { %164 = vsyncpa [#allocation3], 1 }
 0x135   :  { %165 = vsyncpa [#allocation4], 1 }

</bundles_post_ra>
